<compile_context>
chip_gen: v5e
topology: v5e:2x2
jax: 0.10.0
libtpu: 0.0.40
codegen_flags: <defaults>
</compile_context>

<pallas_src>
import jax
import jax.numpy as jnp
from jax.experimental import pallas as pl
from jax.experimental.pallas import tpu as pltpu

HID = 64      # Actor hidden width per the PyTorch spec
HID_P = 128   # lane-dense padded hidden width used inside the kernel


def actor_kernel(obs_ref, w1_ref, b1_ref, w2_ref, b2_ref, w3_ref, b3_ref, out_ref):
    # Layer 1: Linear(obs_dim, 64->128 padded) + ReLU  (f32 accumulation on MXU)
    h1 = jnp.dot(obs_ref[...], w1_ref[...], preferred_element_type=jnp.float32)
    h1 = jnp.maximum(h1 + b1_ref[...], 0.0)
    # Layer 2: Linear(128, 128) + ReLU
    h2 = jnp.dot(h1.astype(w2_ref.dtype), w2_ref[...],
                 preferred_element_type=jnp.float32)
    h2 = jnp.maximum(h2 + b2_ref[...], 0.0)
    # Layer 3: Linear(128, n_out) + Tanh
    h3 = jnp.dot(h2.astype(w3_ref.dtype), w3_ref[...],
                 preferred_element_type=jnp.float32)
    out_ref[...] = jnp.tanh(h3 + b3_ref[...]).astype(out_ref.dtype)


def prepare_actor_params(params, *, use_bf16=False):
    """One-time weight preparation (hoisted out of the per-call path).

    Pads hidden 64->128 and act_dim to a multiple of 8 (all exact: padded
    columns/rows are zero), and optionally casts weights to bf16 (biases stay
    f32; accumulation in-kernel is f32).
    """
    obs_dim, hid = params["w1"].shape
    act_dim = params["w3"].shape[1]
    assert params["w2"].shape == (hid, hid)
    hid_p = max(HID_P, pl.cdiv(hid, 128) * 128)
    # Pad output columns only to a sublane multiple (8).  Padding 4 -> 128
    # would make output writeback the dominant HBM stream (32x inflation).
    n_out = max(8, pl.cdiv(act_dim, 8) * 8)

    op_dt = jnp.bfloat16 if use_bf16 else jnp.float32

    def pad2(a, rows, cols):
        a = jnp.asarray(a, jnp.float32).reshape((-1, a.shape[-1]))
        return jnp.zeros((rows, cols), jnp.float32).at[: a.shape[0], : a.shape[1]].set(a)

    w1 = pad2(params["w1"], obs_dim, hid_p).astype(op_dt)
    b1 = pad2(params["b1"], 1, hid_p)                      # f32
    w2 = pad2(params["w2"], hid_p, hid_p).astype(op_dt)
    b2 = pad2(params["b2"], 1, hid_p)                      # f32
    w3 = pad2(params["w3"], hid_p, n_out).astype(op_dt)
    b3 = pad2(params["b3"], 1, n_out)                      # f32

    return dict(w1=w1, b1=b1, w2=w2, b2=b2, w3=w3, b3=b3,
                obs_dim=obs_dim, act_dim=act_dim, hid_p=hid_p, n_out=n_out,
                op_dtype=op_dt)


def actor_forward(obs, prep, *, tb=512):
    """obs: (B, obs_dim) f32.  prep: output of prepare_actor_params.

    Returns (B, act_dim) f32.
    """
    B, obs_dim = obs.shape
    assert obs_dim == prep["obs_dim"]
    hid_p, n_out, act_dim = prep["hid_p"], prep["n_out"], prep["act_dim"]
    op_dt = prep["op_dtype"]

    # Batch tiling: big tiles (default cap 512 rows; VMEM footprint per step is
    # well under 2 MB) to amortize the ~0.35 us per-grid-step overhead.  No
    # forced split into >=2 steps: serial overhead on v5e/v6e (1 TC); on v7x a
    # multi-step parallel grid for megacore sharding appears once B > tb.
    mult = 16 if op_dt == jnp.bfloat16 else 8   # bf16 packs 16 rows per sublane
    tb = max(mult, (min(tb, pl.cdiv(B, mult) * mult) // mult) * mult)
    Bp = pl.cdiv(B, tb) * tb
    if Bp == B and obs.dtype == op_dt:
        obs_p = obs
    else:
        obs_p = jnp.pad(obs, ((0, Bp - B), (0, 0))).astype(op_dt)

    grid = (Bp // tb,)

    def full_spec(shape):
        # Grid-invariant block: constant index_map -> DMA'd once, reused.
        return pl.BlockSpec(shape, lambda i: (0, 0))

    out_padded = pl.pallas_call(
        actor_kernel,
        out_shape=jax.ShapeDtypeStruct((Bp, n_out), jnp.float32),
        grid=grid,
        in_specs=[
            pl.BlockSpec((tb, obs_dim), lambda i: (i, 0)),   # obs tile
            full_spec((obs_dim, hid_p)),                     # w1
            full_spec((1, hid_p)),                           # b1
            full_spec((hid_p, hid_p)),                       # w2
            full_spec((1, hid_p)),                           # b2
            full_spec((hid_p, n_out)),                       # w3
            full_spec((1, n_out)),                           # b3
        ],
        out_specs=pl.BlockSpec((tb, n_out), lambda i: (i, 0)),
        compiler_params=pltpu.CompilerParams(
            dimension_semantics=("parallel",),
        ),
    )(obs_p, prep["w1"], prep["b1"], prep["w2"], prep["b2"],
      prep["w3"], prep["b3"])

    # Undo batch / output-column padding (exact: padded weights are zero).
    return out_padded[:B, :act_dim]


def init_actor_params(key, obs_dim, act_dim, hid=HID):
    """Init mimicking PyTorch nn.Linear default U(-1/sqrt(fan_in), 1/sqrt(fan_in)).

    Weights stored as (in_dim, out_dim) so the kernel computes y = x @ W + b.
    """
    ks = jax.random.split(key, 6)

    def linear(kw, kb, fan_in, fan_out):
        bound = 1.0 / jnp.sqrt(jnp.float32(fan_in))
        w = jax.random.uniform(kw, (fan_in, fan_out), jnp.float32, -bound, bound)
        b = jax.random.uniform(kb, (1, fan_out), jnp.float32, -bound, bound)
        return w, b

    w1, b1 = linear(ks[0], ks[1], obs_dim, hid)
    w2, b2 = linear(ks[2], ks[3], hid, hid)
    w3, b3 = linear(ks[4], ks[5], hid, act_dim)
    return dict(w1=w1, b1=b1, w2=w2, b2=b2, w3=w3, b3=b3)


def actor_ref(obs, p):
    h1 = jnp.maximum(obs @ p["w1"] + p["b1"], 0.0)
    h2 = jnp.maximum(h1 @ p["w2"] + p["b2"], 0.0)
    return jnp.tanh(h2 @ p["w3"] + p["b3"])


if __name__ == "__main__":
    key = jax.random.PRNGKey(0)
    k_obs, k_par = jax.random.split(key)

    B, obs_dim, act_dim = 256, 16, 4
    obs = jax.random.normal(k_obs, (B, obs_dim), jnp.float32)
    params = init_actor_params(k_par, obs_dim, act_dim)
    ref = actor_ref(obs, params)

    # f32 path (weights prepared once, reused across calls).
    prep_f32 = prepare_actor_params(params)
    out = jax.block_until_ready(actor_forward(obs, prep_f32))
    assert out.shape == (B, act_dim)
    assert float(jnp.max(jnp.abs(out - ref))) < 1e-5, "f32 mismatch vs reference"

    # bf16-operand path (f32 accumulation); looser tolerance for tanh output.
    prep_bf16 = prepare_actor_params(params, use_bf16=True)
    out_bf16 = jax.block_until_ready(actor_forward(obs, prep_bf16))
    assert out_bf16.shape == (B, act_dim)
    assert float(jnp.max(jnp.abs(out_bf16 - ref))) < 5e-2, "bf16 mismatch vs reference"

    # Ragged batch (exercises batch zero-padding path).
    out_small = jax.block_until_ready(actor_forward(obs[:13], prep_f32))
    assert out_small.shape == (13, act_dim)
    assert float(jnp.max(jnp.abs(out_small - ref[:13]))) < 1e-5, "ragged-batch mismatch"

    print("KERNEL_OK")
</pallas_src>

<mosaic_0001>
module attributes {stable_mosaic.version = 11 : i64} {
  func.func @actor_kernel(%arg0: i32, %arg1: memref<256x16xf32, #tpu.memory_space<vmem>>, %arg2: memref<16x128xf32, #tpu.memory_space<vmem>>, %arg3: memref<1x128xf32, #tpu.memory_space<vmem>>, %arg4: memref<128x128xf32, #tpu.memory_space<vmem>>, %arg5: memref<1x128xf32, #tpu.memory_space<vmem>>, %arg6: memref<128x8xf32, #tpu.memory_space<vmem>>, %arg7: memref<1x8xf32, #tpu.memory_space<vmem>>, %arg8: memref<256x8xf32, #tpu.memory_space<vmem>>) attributes {dimension_semantics = [#tpu.dimension_semantics<parallel>], iteration_bounds = array<i64: 1>, scalar_prefetch = 0 : i64, scratch_operands = 0 : i64, tpu.core_type = #tpu.core_type<tc>, window_params = [{transform_indices = @transform_0, window_bounds = array<i64: 256, 16>}, {pipeline_mode = #tpu.pipeline_mode<synchronous>, transform_indices = @transform_1, window_bounds = array<i64: 16, 128>}, {pipeline_mode = #tpu.pipeline_mode<synchronous>, transform_indices = @transform_2, window_bounds = array<i64: 1, 128>}, {pipeline_mode = #tpu.pipeline_mode<synchronous>, transform_indices = @transform_3, window_bounds = array<i64: 128, 128>}, {pipeline_mode = #tpu.pipeline_mode<synchronous>, transform_indices = @transform_4, window_bounds = array<i64: 1, 128>}, {pipeline_mode = #tpu.pipeline_mode<synchronous>, transform_indices = @transform_5, window_bounds = array<i64: 128, 8>}, {pipeline_mode = #tpu.pipeline_mode<synchronous>, transform_indices = @transform_6, window_bounds = array<i64: 1, 8>}, {transform_indices = @transform_7, window_bounds = array<i64: 256, 8>}]} {
    %c0 = arith.constant 0 : index
    %c0_0 = arith.constant 0 : index
    %0 = vector.load %arg1[%c0, %c0_0] : memref<256x16xf32, #tpu.memory_space<vmem>>, vector<256x16xf32>
    %c0_1 = arith.constant 0 : index
    %c0_2 = arith.constant 0 : index
    %1 = vector.load %arg2[%c0_1, %c0_2] : memref<16x128xf32, #tpu.memory_space<vmem>>, vector<16x128xf32>
    %cst = arith.constant dense<0.000000e+00> : vector<256x128xf32>
    %2 = tpu.matmul %0, %1, %cst {dimension_numbers = #tpu.dot_dimension_numbers<[1], [0], [0], [1], [0, 0, 1, 1], [], []>} : vector<256x16xf32>, vector<16x128xf32>, vector<256x128xf32> -> vector<256x128xf32>
    %c0_3 = arith.constant 0 : index
    %c0_4 = arith.constant 0 : index
    %3 = vector.load %arg3[%c0_3, %c0_4] : memref<1x128xf32, #tpu.memory_space<vmem>>, vector<1x128xf32>
    %4 = vector.broadcast %3 : vector<1x128xf32> to vector<256x128xf32>
    %5 = arith.addf %2, %4 : vector<256x128xf32>
    %cst_5 = arith.constant 0.000000e+00 : f32
    %6 = vector.broadcast %cst_5 : f32 to vector<256x128xf32>
    %7 = arith.maximumf %5, %6 : vector<256x128xf32>
    %c0_6 = arith.constant 0 : index
    %c0_7 = arith.constant 0 : index
    %8 = vector.load %arg4[%c0_6, %c0_7] : memref<128x128xf32, #tpu.memory_space<vmem>>, vector<128x128xf32>
    %cst_8 = arith.constant dense<0.000000e+00> : vector<256x128xf32>
    %9 = tpu.matmul %7, %8, %cst_8 {dimension_numbers = #tpu.dot_dimension_numbers<[1], [0], [0], [1], [0, 0, 1, 1], [], []>} : vector<256x128xf32>, vector<128x128xf32>, vector<256x128xf32> -> vector<256x128xf32>
    %c0_9 = arith.constant 0 : index
    %c0_10 = arith.constant 0 : index
    %10 = vector.load %arg5[%c0_9, %c0_10] : memref<1x128xf32, #tpu.memory_space<vmem>>, vector<1x128xf32>
    %11 = vector.broadcast %10 : vector<1x128xf32> to vector<256x128xf32>
    %12 = arith.addf %9, %11 : vector<256x128xf32>
    %cst_11 = arith.constant 0.000000e+00 : f32
    %13 = vector.broadcast %cst_11 : f32 to vector<256x128xf32>
    %14 = arith.maximumf %12, %13 : vector<256x128xf32>
    %c0_12 = arith.constant 0 : index
    %c0_13 = arith.constant 0 : index
    %15 = vector.load %arg6[%c0_12, %c0_13] : memref<128x8xf32, #tpu.memory_space<vmem>>, vector<128x8xf32>
    %cst_14 = arith.constant dense<0.000000e+00> : vector<256x8xf32>
    %16 = tpu.matmul %14, %15, %cst_14 {dimension_numbers = #tpu.dot_dimension_numbers<[1], [0], [0], [1], [0, 0, 1, 1], [], []>} : vector<256x128xf32>, vector<128x8xf32>, vector<256x8xf32> -> vector<256x8xf32>
    %c0_15 = arith.constant 0 : index
    %c0_16 = arith.constant 0 : index
    %17 = vector.load %arg7[%c0_15, %c0_16] : memref<1x8xf32, #tpu.memory_space<vmem>>, vector<1x8xf32>
    %18 = vector.broadcast %17 : vector<1x8xf32> to vector<256x8xf32>
    %19 = arith.addf %16, %18 : vector<256x8xf32>
    %20 = math.tanh %19 : vector<256x8xf32>
    %c0_17 = arith.constant 0 : index
    %c0_18 = arith.constant 0 : index
    %21 = vector.load %arg8[%c0_17, %c0_18] : memref<256x8xf32, #tpu.memory_space<vmem>>, vector<256x8xf32>
    tpu.vector_store %arg8[%c0_17, %c0_18], %20 {strides = array<i32>} : memref<256x8xf32, #tpu.memory_space<vmem>>, vector<256x8xf32>,
    return
  }
  func.func @transform_0(%arg0: i32) -> (i32, i32) {
    %c0_i32 = arith.constant 0 : i32
    %c0_i32_0 = arith.constant 0 : i32
    return %arg0, %c0_i32 : i32, i32
  }
  func.func @transform_1(%arg0: i32) -> (i32, i32) {
    %c0_i32 = arith.constant 0 : i32
    %c0_i32_0 = arith.constant 0 : i32
    %c0_i32_1 = arith.constant 0 : i32
    return %c0_i32, %c0_i32_0 : i32, i32
  }
  func.func @transform_2(%arg0: i32) -> (i32, i32) {
    %c0_i32 = arith.constant 0 : i32
    %c0_i32_0 = arith.constant 0 : i32
    %c0_i32_1 = arith.constant 0 : i32
    return %c0_i32, %c0_i32_0 : i32, i32
  }
  func.func @transform_3(%arg0: i32) -> (i32, i32) {
    %c0_i32 = arith.constant 0 : i32
    %c0_i32_0 = arith.constant 0 : i32
    %c0_i32_1 = arith.constant 0 : i32
    return %c0_i32, %c0_i32_0 : i32, i32
  }
  func.func @transform_4(%arg0: i32) -> (i32, i32) {
    %c0_i32 = arith.constant 0 : i32
    %c0_i32_0 = arith.constant 0 : i32
    %c0_i32_1 = arith.constant 0 : i32
    return %c0_i32, %c0_i32_0 : i32, i32
  }
  func.func @transform_5(%arg0: i32) -> (i32, i32) {
    %c0_i32 = arith.constant 0 : i32
    %c0_i32_0 = arith.constant 0 : i32
    %c0_i32_1 = arith.constant 0 : i32
    return %c0_i32, %c0_i32_0 : i32, i32
  }
  func.func @transform_6(%arg0: i32) -> (i32, i32) {
    %c0_i32 = arith.constant 0 : i32
    %c0_i32_0 = arith.constant 0 : i32
    %c0_i32_1 = arith.constant 0 : i32
    return %c0_i32, %c0_i32_0 : i32, i32
  }
  func.func @transform_7(%arg0: i32) -> (i32, i32) {
    %c0_i32 = arith.constant 0 : i32
    %c0_i32_0 = arith.constant 0 : i32
    return %arg0, %c0_i32 : i32, i32
  }
}

</mosaic_0001>

<bundles_post_ra>
// kernel: tpu_custom_call.1
= control target key start
LH: loop header
LB: loop body
LE: loop exit
PB: predicated region body
PF: predicated region fallthrough
CT: control target
= control target key end

     0   :  { %vm64_vm0 = vcmask 130048   ;;  %vm636_vm1 = vcmask 64512   ;;  %s1315_s1 = inlined_call_operand.vmem [shape: f32[16,128], index: 1, kind: input, shape index: {}]   ;;  %s1316_s0 = inlined_call_operand.vmem [shape: f32[256,16], index: 0, kind: input, shape index: {}]   ;;  %s1317_s2 = inlined_call_operand.vmem [shape: f32[1,128], index: 2, kind: input, shape index: {}]   ;;  %s1318_s3 = inlined_call_operand.vmem [shape: f32[128,128], index: 3, kind: input, shape index: {}]   ;;  %s1319_s4 = inlined_call_operand.vmem [shape: f32[1,128], index: 4, kind: input, shape index: {}]   ;;  %s1320_s5 = inlined_call_operand.vmem [shape: f32[128,8], index: 5, kind: input, shape index: {}]   ;;  %s1321_s6 = inlined_call_operand.vmem [shape: f32[1,8], index: 6, kind: input, shape index: {}]   ;;  %s1322_s7 = inlined_call_operand.vmem [shape: f32[256,8], index: 7, kind: output, shape index: {}]  }
   0x1   :  { %v59_v0 = vld [vmem:[%s1315_s1 + $0x8] sm:$0xff]  ;;  %v58_v1 = vld [vmem:[%s1315_s1] sm:$0xff]  ;;  %v28_v4 = vld [vmem:[%s1316_s0 + $0x10] sm:$0xff] }
   0x2   :  { %175 = vmatpush.msra.mxu0 %v59_v0  ;;  %v26_v2 = vld [vmem:[%s1316_s0] sm:$0xff]  ;;  %705 = vmatpush.msra.mxu3 %v59_v0  ;;  %v27_v3 = vld [vmem:[%s1316_s0 + $0x8] sm:$0xff]  ;;  %v29_v5 = vld [vmem:[%s1316_s0 + $0x18] sm:$0xff] }
   0x3   :  { %v30_v6 = vld [vmem:[%s1316_s0 + $0x20] sm:$0xff]  ;;  %v31_v7 = vld [vmem:[%s1316_s0 + $0x28] sm:$0xff]  ;;  %v32_v8 = vld [vmem:[%s1316_s0 + $0x30] sm:$0xff] }
   0x4   :  { %176 = vmatpush.msra.mxu0 %v58_v1  ;;  %706 = vmatpush.msra.mxu3 %v58_v1  ;;  %v33_v9 = vld [vmem:[%s1316_s0 + $0x38] sm:$0xff]  ;;  %v34_v10 = vld [vmem:[%s1316_s0 + $0x40] sm:$0xff]  ;;  %v320_v12 = vld [vmem:[%s1318_s3 + $0x70] sm:$0xff] }
   0x5   :  { %673 = vmatmul.msk.f32.vlgmr.msra.gmra.mxu0 %vm64_vm0, %v26_v2  ;;  %v321_v11 = vld [vmem:[%s1318_s3 + $0x78] sm:$0xff]  ;;  %v319_v13 = vld [vmem:[%s1318_s3 + $0x68] sm:$0xff]  ;;  %v318_v15 = vld [vmem:[%s1318_s3 + $0x60] sm:$0xff] }
   0x6   :  { %326 = vmatpush.msra.mxu1 %v321_v11  ;;  %707 = vmatpush.msrb.mxu3 %v321_v11  ;;  %v35_v14 = vld [vmem:[%s1316_s0 + $0x48] sm:$0xff]  ;;  %v317_v16 = vld [vmem:[%s1318_s3 + $0x58] sm:$0xff]  ;;  %v316_v17 = vld [vmem:[%s1318_s3 + $0x50] sm:$0xff] }
   0x7   :  { %v315_v18 = vld [vmem:[%s1318_s3 + $0x48] sm:$0xff]  ;;  %v36_v19 = vld [vmem:[%s1316_s0 + $0x50] sm:$0xff]  ;;  %v314_v20 = vld [vmem:[%s1318_s3 + $0x40] sm:$0xff] }
   0x8   :  { %327 = vmatpush.msra.mxu1 %v320_v12  ;;  %708 = vmatpush.msrb.mxu3 %v320_v12  ;;  %v313_v21 = vld [vmem:[%s1318_s3 + $0x38] sm:$0xff]  ;;  %v312_v22 = vld [vmem:[%s1318_s3 + $0x30] sm:$0xff]  ;;  %v311_v23 = vld [vmem:[%s1318_s3 + $0x28] sm:$0xff] }
   0x9   :  { %v37_v24 = vld [vmem:[%s1316_s0 + $0x58] sm:$0xff]  ;;  %v310_v25 = vld [vmem:[%s1318_s3 + $0x20] sm:$0xff]  ;;  %v308_v27 = vld [vmem:[%s1318_s3 + $0x10] sm:$0xff] }
   0xa   :  { %328 = vmatpush.msra.mxu1 %v319_v13  ;;  %709 = vmatpush.msrb.mxu3 %v319_v13  ;;  %v309_v26 = vld [vmem:[%s1318_s3 + $0x18] sm:$0xff]  ;;  %v38_v28 = vld [vmem:[%s1316_s0 + $0x60] sm:$0xff]  ;;  %v307_v29 = vld [vmem:[%s1318_s3 + $0x8] sm:$0xff] }
   0xb   :  { %v306_v30 = vld [vmem:[%s1318_s3] sm:$0xff]  ;;  %v39_v31 = vld [vmem:[%s1316_s0 + $0x68] sm:$0xff]  ;;  %v40_v32 = vld [vmem:[%s1316_s0 + $0x70] sm:$0xff] }
   0xc   :  { %329 = vmatpush.msra.mxu1 %v318_v15  ;;  %710 = vmatpush.msrb.mxu3 %v318_v15  ;;  %v41_v33 = vld [vmem:[%s1316_s0 + $0x78] sm:$0xff]  ;;  %v967_v34 = vld [vmem:[%s1317_s2] ss:$0 sm:$0xff]  ;;  %v43_v40 = vld [vmem:[%s1316_s0 + $0x88] sm:$0xff] }
   0xd   :  { %674 = vmatmul.msk.f32.gmra.mxu0 %vm64_vm0, %v27_v3  ;;  %v42_v36 = vld [vmem:[%s1316_s0 + $0x80] sm:$0xff]  ;;  %v44_v44 = vld [vmem:[%s1316_s0 + $0x90] sm:$0xff]  ;;  %v45_v48 = vld [vmem:[%s1316_s0 + $0x98] sm:$0xff] }
   0xe   :  { %330 = vmatpush.msra.mxu1 %v317_v16  ;;  %711 = vmatpush.msrb.mxu3 %v317_v16  ;;  %v46_v52 = vld [vmem:[%s1316_s0 + $0xa0] sm:$0xff]  ;;  %v47_v56 = vld [vmem:[%s1316_s0 + $0xa8] sm:$0xff]  ;;  %v52_v59 = vld [vmem:[%s1316_s0 + $0xd0] sm:$0xff] }
   0xf   :  { %699 = vmatmul.msk.f32.vlgmr.msra.gmra.mxu3 %vm64_vm0, %v52_v59  ;;  %v48_v61 = vld [vmem:[%s1316_s0 + $0xb0] sm:$0xff]  ;;  %v53_v0 = vld [vmem:[%s1316_s0 + $0xd8] sm:$0xff]  ;;  %v51_v13 = vld [vmem:[%s1316_s0 + $0xc8] sm:$0xff] }
  0x10   :  { %331 = vmatpush.msra.mxu1 %v316_v17  ;;  %712 = vmatpush.msrb.mxu3 %v316_v17  ;;  %v49_v2 = vld [vmem:[%s1316_s0 + $0xb8] sm:$0xff]  ;;  %v485_v15 = vld [vmem:[%s1320_s5 + $0x70] sm:$0xff]  ;;  %v484_v17 = vld [vmem:[%s1320_s5 + $0x68] sm:$0xff] }
  0x11   :  { %v486_v11 = vld [vmem:[%s1320_s5 + $0x78] sm:$0xff] }
  0x12   :  { %332 = vmatpush.msra.mxu1 %v315_v18  ;;  %713 = vmatpush.msrb.mxu3 %v315_v18  ;;  %v56_v18 = vld [vmem:[%s1316_s0 + $0xf0] sm:$0xff] }
  0x13   :  { %491 = vmatpush.msra.mxu2 %v486_v11 }
  0x14   :  { %333 = vmatpush.msra.mxu1 %v314_v20  ;;  %714 = vmatpush.msrb.mxu3 %v314_v20  ;;  %v482_v20 = vld [vmem:[%s1320_s5 + $0x58] sm:$0xff] }
  0x15   :  { %675 = vmatmul.msk.f32.gmra.mxu0 %vm64_vm0, %v28_v4  ;;  %492 = vmatpush.msra.mxu2 %v485_v15 }
  0x16   :  { %334 = vmatpush.msra.mxu1 %v313_v21  ;;  %715 = vmatpush.msrb.mxu3 %v313_v21 }
  0x17   :  { %700 = vmatmul.msk.f32.gmra.mxu3 %vm64_vm0, %v53_v0  ;;  %493 = vmatpush.msra.mxu2 %v484_v17 }
  0x18   :  { %335 = vmatpush.msra.mxu1 %v312_v22  ;;  %716 = vmatpush.msrb.mxu3 %v312_v22 }
  0x1a   :  { %336 = vmatpush.msra.mxu1 %v311_v23  ;;  %717 = vmatpush.msrb.mxu3 %v311_v23  ;;  %v481_v23 = vld [vmem:[%s1320_s5 + $0x50] sm:$0xff] }
  0x1c   :  { %337 = vmatpush.msra.mxu1 %v310_v25  ;;  %718 = vmatpush.msrb.mxu3 %v310_v25  ;;  %v480_v25 = vld [vmem:[%s1320_s5 + $0x48] sm:$0xff] }
  0x1d   :  { %676 = vmatmul.msk.f32.gmra.mxu0 %vm64_vm0, %v29_v5  ;;  %v54_v5 = vld [vmem:[%s1316_s0 + $0xe0] sm:$0xff] }
  0x1e   :  { %338 = vmatpush.msra.mxu1 %v309_v26  ;;  %719 = vmatpush.msrb.mxu3 %v309_v26  ;;  %v57_v26 = vld [vmem:[%s1316_s0 + $0xf8] sm:$0xff] }
  0x1f   :  { %701 = vmatmul.msk.f32.gmra.mxu3 %vm64_vm0, %v54_v5 }
  0x20   :  { %339 = vmatpush.msra.mxu1 %v308_v27  ;;  %720 = vmatpush.msrb.mxu3 %v308_v27  ;;  %v479_v27 = vld [vmem:[%s1320_s5 + $0x40] sm:$0xff] }
  0x22   :  { %340 = vmatpush.msra.mxu1 %v307_v29  ;;  %721 = vmatpush.msrb.mxu3 %v307_v29 }
  0x24   :  { %341 = vmatpush.msra.mxu1 %v306_v30  ;;  %722 = vmatpush.msrb.mxu3 %v306_v30 }
  0x25   :  { %677 = vmatmul.msk.f32.gmra.mxu0 %vm64_vm0, %v30_v6 }
  0x26   :  { %723 = vmatpush.msra.mxu3 %v486_v11 }
  0x28   :  { %724 = vmatpush.msra.mxu3 %v485_v15 }
  0x2a   :  { %725 = vmatpush.msra.mxu3 %v484_v17 }
  0x2d   :  { %678 = vmatmul.msk.f32.gmra.mxu0 %vm64_vm0, %v31_v7  ;;  %v50_v7 = vld [vmem:[%s1316_s0 + $0xc0] sm:$0xff] }
  0x35   :  { %679 = vmatmul.msk.f32.gmra.mxu0 %vm64_vm0, %v32_v8 }
  0x3d   :  { %680 = vmatmul.msk.f32.gmra.mxu0 %vm64_vm0, %v33_v9 }
  0x45   :  { %681 = vmatmul.msk.f32.gmra.mxu0 %vm64_vm0, %v34_v10  ;;  %v55_v10 = vld [vmem:[%s1316_s0 + $0xe8] sm:$0xff] }
  0x46   :  { %702 = vmatmul.msk.f32.gmra.mxu3 %vm64_vm0, %v55_v10 }
  0x4d   :  { %682 = vmatmul.msk.f32.gmra.mxu0 %vm64_vm0, %v35_v14 }
  0x4e   :  { %703 = vmatmul.msk.f32.gmra.mxu3 %vm64_vm0, %v56_v18 }
  0x55   :  { %683 = vmatmul.msk.f32.gmra.mxu0 %vm64_vm0, %v36_v19  ;;  %v483_v19 = vld [vmem:[%s1320_s5 + $0x60] sm:$0xff] }
  0x56   :  { %494 = vmatpush.msra.mxu2 %v483_v19  ;;  %726 = vmatpush.msra.mxu3 %v483_v19 }
  0x57   :  { %704 = vmatmul.msk.f32.gmra.mxu3 %vm64_vm0, %v57_v26 }
  0x58   :  { %495 = vmatpush.msra.mxu2 %v482_v20  ;;  %727 = vmatpush.msra.mxu3 %v482_v20 }
  0x5a   :  { %496 = vmatpush.msra.mxu2 %v481_v23  ;;  %728 = vmatpush.msra.mxu3 %v481_v23 }
  0x5c   :  { %497 = vmatpush.msra.mxu2 %v480_v25  ;;  %729 = vmatpush.msra.mxu3 %v480_v25 }
  0x5d   :  { %684 = vmatmul.msk.f32.gmra.mxu0 %vm64_vm0, %v37_v24 }
  0x5e   :  { %498 = vmatpush.msra.mxu2 %v479_v27  ;;  %730 = vmatpush.msra.mxu3 %v479_v27 }
  0x65   :  { %685 = vmatmul.msk.f32.gmra.mxu0 %vm64_vm0, %v38_v28  ;;  %v478_v28 = vld [vmem:[%s1320_s5 + $0x38] sm:$0xff] }
  0x66   :  { %499 = vmatpush.msra.mxu2 %v478_v28  ;;  %731 = vmatpush.msra.mxu3 %v478_v28 }
  0x6d   :  { %686 = vmatmul.msk.f32.gmra.mxu0 %vm64_vm0, %v39_v31  ;;  %v477_v31 = vld [vmem:[%s1320_s5 + $0x30] sm:$0xff] }
  0x6e   :  { %500 = vmatpush.msra.mxu2 %v477_v31  ;;  %732 = vmatpush.msra.mxu3 %v477_v31 }
  0x75   :  { %687 = vmatmul.msk.f32.gmra.mxu0 %vm64_vm0, %v40_v32 }
  0x7d   :  { %688 = vmatmul.msk.f32.gmra.mxu0 %vm64_vm0, %v41_v33  ;;  %v476_v33 = vld [vmem:[%s1320_s5 + $0x28] sm:$0xff] }
  0x7e   :  { %501 = vmatpush.msra.mxu2 %v476_v33  ;;  %733 = vmatpush.msra.mxu3 %v476_v33 }
  0x82   :  { %v178_v35 = vpop.f32.mrf.mxu0 }
  0x83   :  { %v179_v37 = vadd.f32 %v967_v34, %v178_v35  ;;  %v475_v35 = vld [vmem:[%s1320_s5 + $0x20] sm:$0xff] }
  0x84   :  { %502 = vmatpush.msra.mxu2 %v475_v35  ;;  %734 = vmatpush.msra.mxu3 %v475_v35 }
  0x85   :  { %689 = vmatmul.msk.f32.gmra.mxu0 %vm64_vm0, %v42_v36  ;;  %v274_v38 = vmax.f32 %v179_v37, 0.0  ;;  %v474_v36 = vld [vmem:[%s1320_s5 + $0x18] sm:$0xff] }
  0x86   :  { %503 = vmatpush.msra.mxu2 %v474_v36  ;;  %735 = vmatpush.msra.mxu3 %v474_v36 }
  0x87   :  { %342 = vmatmul.f32.vlgmr.msra.gmra.mxu1 %v274_v38 }
  0x8a   :  { %v181_v39 = vpop.f32.mrf.mxu0 }
  0x8b   :  { %v182_v41 = vadd.f32 %v967_v34, %v181_v39  ;;  %v473_v39 = vld [vmem:[%s1320_s5 + $0x10] sm:$0xff] }
  0x8c   :  { %504 = vmatpush.msra.mxu2 %v473_v39  ;;  %736 = vmatpush.msra.mxu3 %v473_v39 }
  0x8d   :  { %690 = vmatmul.msk.f32.gmra.mxu0 %vm64_vm0, %v43_v40  ;;  %v275_v42 = vmax.f32 %v182_v41, 0.0  ;;  %v472_v41 = vld [vmem:[%s1320_s5 + $0x8] sm:$0xff] }
  0x8e   :  { %505 = vmatpush.msra.mxu2 %v472_v41  ;;  %737 = vmatpush.msra.mxu3 %v472_v41 }
  0x8f   :  { %345 = vmatmul.f32.gmra.mxu1 %v275_v42  ;;  %v471_v42 = vld [vmem:[%s1320_s5] sm:$0xff] }
  0x90   :  { %506 = vmatpush.msra.mxu2 %v471_v42  ;;  %738 = vmatpush.msra.mxu3 %v471_v42 }
  0x92   :  { %v184_v43 = vpop.f32.mrf.mxu0  ;;  %v256_v39 = vpop.f32.mrf.mxu3 }
  0x93   :  { %v185_v45 = vadd.f32 %v967_v34, %v184_v43 }
  0x95   :  { %v276_v46 = vmax.f32 %v185_v45, 0.0  ;;  %691 = vmatmul.msk.f32.gmra.mxu0 %vm64_vm0, %v44_v44 }
  0x97   :  { %348 = vmatmul.f32.gmra.mxu1 %v276_v46 }
  0x9a   :  { %v187_v47 = vpop.f32.mrf.mxu0 }
  0x9b   :  { %v188_v49 = vadd.f32 %v967_v34, %v187_v47 }
  0x9d   :  { %v277_v50 = vmax.f32 %v188_v49, 0.0  ;;  %692 = vmatmul.msk.f32.gmra.mxu0 %vm64_vm0, %v45_v48 }
  0x9f   :  { %351 = vmatmul.f32.gmra.mxu1 %v277_v50 }
  0xa2   :  { %v190_v51 = vpop.f32.mrf.mxu0 }
  0xa3   :  { %v191_v53 = vadd.f32 %v967_v34, %v190_v51 }
  0xa5   :  { %v278_v54 = vmax.f32 %v191_v53, 0.0  ;;  %693 = vmatmul.msk.f32.gmra.mxu0 %vm64_vm0, %v46_v52  ;;  %v1100_v52 = vld [vmem:[%s1319_s4] ss:$0 sm:$0xff] }
  0xa7   :  { %354 = vmatmul.f32.gmra.mxu1 %v278_v54 }
  0xaa   :  { %v193_v55 = vpop.f32.mrf.mxu0 }
  0xab   :  { %v194_v57 = vadd.f32 %v967_v34, %v193_v55 }
  0xad   :  { %v279_v58 = vmax.f32 %v194_v57, 0.0  ;;  %694 = vmatmul.msk.f32.gmra.mxu0 %vm64_vm0, %v47_v56 }
  0xaf   :  { %357 = vmatmul.f32.gmra.mxu1 %v279_v58 }
  0xb2   :  { %v196_v60 = vpop.f32.mrf.mxu0 }
  0xb3   :  { %v197_v62 = vadd.f32 %v967_v34, %v196_v60 }
  0xb5   :  { %v280_v63 = vmax.f32 %v197_v62, 0.0  ;;  %695 = vmatmul.msk.f32.gmra.mxu0 %vm64_vm0, %v48_v61 }
  0xb7   :  { %360 = vmatmul.f32.gmra.mxu1 %v280_v63 }
  0xba   :  { %v199_v1 = vpop.f32.mrf.mxu0 }
  0xbb   :  { %v200_v3 = vadd.f32 %v967_v34, %v199_v1 }
  0xbd   :  { %v281_v4 = vmax.f32 %v200_v3, 0.0  ;;  %696 = vmatmul.msk.f32.gmra.mxu0 %vm64_vm0, %v49_v2 }
  0xbf   :  { %363 = vmatmul.f32.gmra.mxu1 %v281_v4 }
  0xc2   :  { %v202_v6 = vpop.f32.mrf.mxu0 }
  0xc3   :  { %v203_v8 = vadd.f32 %v967_v34, %v202_v6 }
  0xc5   :  { %v282_v9 = vmax.f32 %v203_v8, 0.0  ;;  %697 = vmatmul.msk.f32.gmra.mxu0 %vm64_vm0, %v50_v7 }
  0xc7   :  { %366 = vmatmul.f32.gmra.mxu1 %v282_v9 }
  0xca   :  { %v205_v12 = vpop.f32.mrf.mxu0 }
  0xcb   :  { %v206_v14 = vadd.f32 %v967_v34, %v205_v12 }
  0xcd   :  { %v283_v16 = vmax.f32 %v206_v14, 0.0  ;;  %698 = vmatmul.msk.f32.gmra.mxu0 %vm64_vm0, %v51_v13 }
  0xcf   :  { %369 = vmatmul.f32.gmra.mxu1 %v283_v16 }
  0xd2   :  { %v208_v21 = vpop.f32.mrf.mxu0 }
  0xd3   :  { %v209_v22 = vadd.f32 %v967_v34, %v208_v21 }
  0xd5   :  { %v284_v24 = vmax.f32 %v209_v22, 0.0 }
  0xd7   :  { %372 = vmatmul.f32.gmra.mxu1 %v284_v24 }
  0xda   :  { %v211_v29 = vpop.f32.mrf.mxu0 }
  0xdb   :  { %v212_v30 = vadd.f32 %v967_v34, %v211_v29 }
  0xdd   :  { %v285_v32 = vmax.f32 %v212_v30, 0.0 }
  0xdf   :  { %375 = vmatmul.f32.gmra.mxu1 %v285_v32 }
  0xe2   :  { %v214_v37 = vpop.f32.mrf.mxu0 }
  0xe3   :  { %v215_v38 = vadd.f32 %v967_v34, %v214_v37 }
  0xe5   :  { %v286_v40 = vmax.f32 %v215_v38, 0.0 }
  0xe7   :  { %378 = vmatmul.f32.gmra.mxu1 %v286_v40 }
  0xea   :  { %v217_v43 = vpop.f32.mrf.mxu0 }
  0xeb   :  { %v218_v44 = vadd.f32 %v967_v34, %v217_v43 }
  0xed   :  { %v287_v45 = vmax.f32 %v218_v44, 0.0 }
  0xef   :  { %381 = vmatmul.f32.gmra.mxu1 %v287_v45 }
  0xf2   :  { %v220_v46 = vpop.f32.mrf.mxu0 }
  0xf3   :  { %v221_v47 = vadd.f32 %v967_v34, %v220_v46 }
  0xf5   :  { %v288_v48 = vmax.f32 %v221_v47, 0.0 }
  0xf7   :  { %384 = vmatmul.f32.gmra.mxu1 %v288_v48  ;;  %v259_v48 = vpop.f32.mrf.mxu3 }
  0xfa   :  { %v223_v49 = vpop.f32.mrf.mxu0 }
  0xfb   :  { %v224_v50 = vadd.f32 %v967_v34, %v223_v49 }
  0xfd   :  { %v289_v51 = vmax.f32 %v224_v50, 0.0 }
  0xff   :  { %387 = vmatmul.f32.gmra.mxu1 %v289_v51 }
 0x102   :  { %v226_v53 = vpop.f32.mrf.mxu0 }
 0x103   :  { %v227_v54 = vadd.f32 %v967_v34, %v226_v53  ;;  %v257_v53 = vadd.f32 %v967_v34, %v256_v39 }
 0x104   :  { %v343_v55 = vpop.f32.mrf.mxu1 }
 0x105   :  { %v290_v56 = vmax.f32 %v227_v54, 0.0  ;;  %v344_v57 = vadd.f32 %v1100_v52, %v343_v55  ;;  %v300_v54 = vmax.f32 %v257_v53, 0.0 }
 0x107   :  { %v439_v58 = vmax.f32 %v344_v57, 0.0  ;;  %390 = vmatmul.f32.gmra.mxu1 %v290_v56  ;;  %v262_v57 = vpop.f32.mrf.mxu3 }
 0x109   :  { %507 = vmatmul.f32.vlgmr.msra.gmra.mxu2 %v439_v58 }
 0x10a   :  { %v229_v59 = vpop.f32.mrf.mxu0 }
 0x10b   :  { %v230_v60 = vadd.f32 %v967_v34, %v229_v59  ;;  %v260_v59 = vadd.f32 %v967_v34, %v259_v48 }
 0x10c   :  { %v346_v61 = vpop.f32.mrf.mxu1 }
 0x10d   :  { %v291_v62 = vmax.f32 %v230_v60, 0.0  ;;  %v347_v63 = vadd.f32 %v1100_v52, %v346_v61  ;;  %v301_v60 = vmax.f32 %v260_v59, 0.0 }
 0x10f   :  { %v440_v0 = vmax.f32 %v347_v63, 0.0  ;;  %393 = vmatmul.f32.gmra.mxu1 %v291_v62 }
 0x111   :  { %510 = vmatmul.f32.gmra.mxu2 %v440_v0  ;;  %v263_v0 = vadd.f32 %v967_v34, %v262_v57 }
 0x112   :  { %v232_v1 = vpop.f32.mrf.mxu0 }
 0x113   :  { %v233_v2 = vadd.f32 %v967_v34, %v232_v1  ;;  %v265_v1 = vpop.f32.mrf.mxu3 }
 0x114   :  { %v349_v3 = vpop.f32.mrf.mxu1 }
 0x115   :  { %v292_v4 = vmax.f32 %v233_v2, 0.0  ;;  %v350_v5 = vadd.f32 %v1100_v52, %v349_v3  ;;  %v302_v2 = vmax.f32 %v263_v0, 0.0 }
 0x117   :  { %v441_v6 = vmax.f32 %v350_v5, 0.0  ;;  %396 = vmatmul.f32.gmra.mxu1 %v292_v4 }
 0x119   :  { %513 = vmatmul.f32.gmra.mxu2 %v441_v6  ;;  %v266_v6 = vadd.f32 %v967_v34, %v265_v1 }
 0x11a   :  { %v235_v7 = vpop.f32.mrf.mxu0 }
 0x11b   :  { %v236_v8 = vadd.f32 %v967_v34, %v235_v7  ;;  %v268_v7 = vpop.f32.mrf.mxu3 }
 0x11c   :  { %v352_v9 = vpop.f32.mrf.mxu1 }
 0x11d   :  { %v293_v10 = vmax.f32 %v236_v8, 0.0  ;;  %v353_v11 = vadd.f32 %v1100_v52, %v352_v9  ;;  %v303_v8 = vmax.f32 %v266_v6, 0.0 }
 0x11f   :  { %v442_v12 = vmax.f32 %v353_v11, 0.0  ;;  %399 = vmatmul.f32.gmra.mxu1 %v293_v10 }
 0x121   :  { %516 = vmatmul.f32.gmra.mxu2 %v442_v12  ;;  %v269_v12 = vadd.f32 %v967_v34, %v268_v7 }
 0x122   :  { %v238_v13 = vpop.f32.mrf.mxu0 }
 0x123   :  { %v239_v14 = vadd.f32 %v967_v34, %v238_v13  ;;  %v304_v13 = vmax.f32 %v269_v12, 0.0 }
 0x124   :  { %v355_v15 = vpop.f32.mrf.mxu1 }
 0x125   :  { %v294_v16 = vmax.f32 %v239_v14, 0.0  ;;  %v356_v17 = vadd.f32 %v1100_v52, %v355_v15  ;;  %v271_v15 = vpop.f32.mrf.mxu3 }
 0x127   :  { %v443_v18 = vmax.f32 %v356_v17, 0.0  ;;  %402 = vmatmul.f32.gmra.mxu1 %v294_v16 }
 0x129   :  { %519 = vmatmul.f32.gmra.mxu2 %v443_v18  ;;  %v272_v18 = vadd.f32 %v967_v34, %v271_v15 }
 0x12a   :  { %v241_v19 = vpop.f32.mrf.mxu0 }
 0x12b   :  { %v242_v20 = vadd.f32 %v967_v34, %v241_v19  ;;  %v305_v19 = vmax.f32 %v272_v18, 0.0 }
 0x12c   :  { %v358_v21 = vpop.f32.mrf.mxu1 }
 0x12d   :  { %v295_v22 = vmax.f32 %v242_v20, 0.0  ;;  %v359_v23 = vadd.f32 %v1100_v52, %v358_v21 }
 0x12f   :  { %v444_v24 = vmax.f32 %v359_v23, 0.0  ;;  %405 = vmatmul.f32.gmra.mxu1 %v295_v22 }
 0x131   :  { %522 = vmatmul.f32.gmra.mxu2 %v444_v24 }
 0x132   :  { %v244_v25 = vpop.f32.mrf.mxu0 }
 0x133   :  { %v245_v26 = vadd.f32 %v967_v34, %v244_v25 }
 0x134   :  { %v361_v27 = vpop.f32.mrf.mxu1 }
 0x135   :  { %v296_v28 = vmax.f32 %v245_v26, 0.0  ;;  %v362_v29 = vadd.f32 %v1100_v52, %v361_v27  ;;  %v1138_v26 = vld [vmem:[%s1321_s6] ss:$0 sm:$0xff] }
 0x137   :  { %v445_v30 = vmax.f32 %v362_v29, 0.0  ;;  %408 = vmatmul.f32.gmra.mxu1 %v296_v28 }
 0x139   :  { %525 = vmatmul.f32.gmra.mxu2 %v445_v30 }
 0x13a   :  { %v247_v31 = vpop.f32.mrf.mxu0 }
 0x13b   :  { %v248_v32 = vadd.f32 %v967_v34, %v247_v31 }
 0x13c   :  { %v364_v33 = vpop.f32.mrf.mxu1 }
 0x13d   :  { %v297_v35 = vmax.f32 %v248_v32, 0.0  ;;  %v365_v36 = vadd.f32 %v1100_v52, %v364_v33 }
 0x13f   :  { %v446_v37 = vmax.f32 %v365_v36, 0.0  ;;  %411 = vmatmul.f32.gmra.mxu1 %v297_v35 }
 0x141   :  { %528 = vmatmul.f32.gmra.mxu2 %v446_v37 }
 0x142   :  { %v250_v38 = vpop.f32.mrf.mxu0 }
 0x143   :  { %v251_v40 = vadd.f32 %v967_v34, %v250_v38 }
 0x144   :  { %v367_v41 = vpop.f32.mrf.mxu1 }
 0x145   :  { %v298_v42 = vmax.f32 %v251_v40, 0.0  ;;  %v368_v43 = vadd.f32 %v1100_v52, %v367_v41 }
 0x147   :  { %v447_v44 = vmax.f32 %v368_v43, 0.0  ;;  %414 = vmatmul.f32.vlgmr.msrb.gmra.mxu3 %v298_v42 }
 0x149   :  { %531 = vmatmul.f32.gmra.mxu2 %v447_v44 }
 0x14a   :  { %v253_v45 = vpop.f32.mrf.mxu0 }
 0x14b   :  { %v254_v46 = vadd.f32 %v967_v34, %v253_v45 }
 0x14c   :  { %v370_v47 = vpop.f32.mrf.mxu1 }
 0x14d   :  { %v299_v49 = vmax.f32 %v254_v46, 0.0  ;;  %v371_v50 = vadd.f32 %v1100_v52, %v370_v47 }
 0x14f   :  { %v448_v51 = vmax.f32 %v371_v50, 0.0  ;;  %417 = vmatmul.f32.gmra.mxu3 %v299_v49 }
 0x151   :  { %534 = vmatmul.f32.gmra.mxu2 %v448_v51 }
 0x154   :  { %v373_v55 = vpop.f32.mrf.mxu1 }
 0x155   :  { %v374_v56 = vadd.f32 %v1100_v52, %v373_v55 }
 0x157   :  { %v449_v58 = vmax.f32 %v374_v56, 0.0  ;;  %420 = vmatmul.f32.gmra.mxu3 %v300_v54 }
 0x159   :  { %537 = vmatmul.f32.gmra.mxu2 %v449_v58 }
 0x15c   :  { %v376_v61 = vpop.f32.mrf.mxu1 }
 0x15d   :  { %v377_v62 = vadd.f32 %v1100_v52, %v376_v61 }
 0x15f   :  { %v450_v63 = vmax.f32 %v377_v62, 0.0  ;;  %423 = vmatmul.f32.gmra.mxu3 %v301_v60 }
 0x161   :  { %540 = vmatmul.f32.gmra.mxu2 %v450_v63 }
 0x164   :  { %v379_v3 = vpop.f32.mrf.mxu1 }
 0x165   :  { %v380_v4 = vadd.f32 %v1100_v52, %v379_v3 }
 0x167   :  { %v451_v5 = vmax.f32 %v380_v4, 0.0  ;;  %426 = vmatmul.f32.gmra.mxu3 %v302_v2 }
 0x169   :  { %543 = vmatmul.f32.gmra.mxu2 %v451_v5 }
 0x16c   :  { %v382_v9 = vpop.f32.mrf.mxu1 }
 0x16d   :  { %v383_v10 = vadd.f32 %v1100_v52, %v382_v9 }
 0x16f   :  { %v452_v11 = vmax.f32 %v383_v10, 0.0  ;;  %429 = vmatmul.f32.gmra.mxu3 %v303_v8 }
 0x171   :  { %546 = vmatmul.f32.gmra.mxu2 %v452_v11 }
 0x174   :  { %v385_v14 = vpop.f32.mrf.mxu1 }
 0x175   :  { %v386_v16 = vadd.f32 %v1100_v52, %v385_v14 }
 0x177   :  { %v453_v17 = vmax.f32 %v386_v16, 0.0  ;;  %432 = vmatmul.f32.gmra.mxu3 %v304_v13 }
 0x179   :  { %549 = vmatmul.f32.gmra.mxu2 %v453_v17 }
 0x17c   :  { %v388_v20 = vpop.f32.mrf.mxu1 }
 0x17d   :  { %v389_v21 = vadd.f32 %v1100_v52, %v388_v20 }
 0x17f   :  { %v454_v22 = vmax.f32 %v389_v21, 0.0  ;;  %435 = vmatmul.f32.gmra.mxu3 %v305_v19 }
 0x181   :  { %552 = vmatmul.f32.gmra.mxu2 %v454_v22 }
 0x184   :  { %v391_v23 = vpop.f32.mrf.mxu1 }
 0x185   :  { %v392_v24 = vadd.f32 %v1100_v52, %v391_v23 }
 0x187   :  { %v455_v25 = vmax.f32 %v392_v24, 0.0 }
 0x189   :  { %555 = vmatmul.f32.gmra.mxu2 %v455_v25 }
 0x18c   :  { %v394_v27 = vpop.f32.mrf.mxu1  ;;  %v508_v34 = vpop.f32.mrf.mxu2 }
 0x18d   :  { %v395_v28 = vadd.f32 %v1100_v52, %v394_v27  ;;  %v509_v29 = vadd.f32 %v1138_v26, %v508_v34 }
 0x18f   :  { %v456_v30 = vmax.f32 %v395_v28, 0.0  ;;  %742 = vtanh.f32 %v509_v29 }
 0x191   :  { %558 = vmatmul.f32.gmra.mxu2 %v456_v30 }
 0x194   :  { %v397_v31 = vpop.f32.mrf.mxu1  ;;  %v511_v32 = vpop.f32.mrf.mxu2 }
 0x195   :  { %v743_v33 = vpop.eup %742  ;;  %v398_v35 = vadd.f32 %v1100_v52, %v397_v31  ;;  %v512_v36 = vadd.f32 %v1138_v26, %v511_v32 }
 0x196   :  { %637 = vst.msk [vmem:[%s1322_s7] sm:$0xff] %vm636_vm1, %v743_v33 }
 0x197   :  { %v457_v37 = vmax.f32 %v398_v35, 0.0  ;;  %744 = vtanh.f32 %v512_v36 }
 0x199   :  { %561 = vmatmul.f32.gmra.mxu2 %v457_v37 }
 0x19c   :  { %v400_v38 = vpop.f32.mrf.mxu1  ;;  %v514_v39 = vpop.f32.mrf.mxu2 }
 0x19d   :  { %v745_v40 = vpop.eup %744  ;;  %v401_v41 = vadd.f32 %v1100_v52, %v400_v38  ;;  %v515_v42 = vadd.f32 %v1138_v26, %v514_v39 }
 0x19e   :  { %638 = vst.msk [vmem:[%s1322_s7 + $0x8] sm:$0xff] %vm636_vm1, %v745_v40 }
 0x19f   :  { %v458_v43 = vmax.f32 %v401_v41, 0.0  ;;  %746 = vtanh.f32 %v515_v42 }
 0x1a1   :  { %564 = vmatmul.f32.gmra.mxu2 %v458_v43 }
 0x1a4   :  { %v403_v44 = vpop.f32.mrf.mxu1  ;;  %v517_v45 = vpop.f32.mrf.mxu2 }
 0x1a5   :  { %v747_v46 = vpop.eup %746  ;;  %v404_v47 = vadd.f32 %v1100_v52, %v403_v44  ;;  %v518_v48 = vadd.f32 %v1138_v26, %v517_v45 }
 0x1a6   :  { %639 = vst.msk [vmem:[%s1322_s7 + $0x10] sm:$0xff] %vm636_vm1, %v747_v46 }
 0x1a7   :  { %v459_v49 = vmax.f32 %v404_v47, 0.0  ;;  %748 = vtanh.f32 %v518_v48 }
 0x1a9   :  { %567 = vmatmul.f32.gmra.mxu2 %v459_v49 }
 0x1ac   :  { %v406_v50 = vpop.f32.mrf.mxu1  ;;  %v520_v51 = vpop.f32.mrf.mxu2 }
 0x1ad   :  { %v749_v53 = vpop.eup %748  ;;  %v407_v54 = vadd.f32 %v1100_v52, %v406_v50  ;;  %v521_v55 = vadd.f32 %v1138_v26, %v520_v51 }
 0x1ae   :  { %640 = vst.msk [vmem:[%s1322_s7 + $0x18] sm:$0xff] %vm636_vm1, %v749_v53 }
 0x1af   :  { %v460_v56 = vmax.f32 %v407_v54, 0.0  ;;  %750 = vtanh.f32 %v521_v55 }
 0x1b1   :  { %570 = vmatmul.f32.gmra.mxu2 %v460_v56 }
 0x1b4   :  { %v409_v57 = vpop.f32.mrf.mxu1  ;;  %v523_v58 = vpop.f32.mrf.mxu2 }
 0x1b5   :  { %v751_v59 = vpop.eup %750  ;;  %v410_v60 = vadd.f32 %v1100_v52, %v409_v57  ;;  %v524_v61 = vadd.f32 %v1138_v26, %v523_v58 }
 0x1b6   :  { %641 = vst.msk [vmem:[%s1322_s7 + $0x20] sm:$0xff] %vm636_vm1, %v751_v59 }
 0x1b7   :  { %v461_v62 = vmax.f32 %v410_v60, 0.0  ;;  %752 = vtanh.f32 %v524_v61 }
 0x1b9   :  { %573 = vmatmul.f32.gmra.mxu2 %v461_v62 }
 0x1bc   :  { %v412_v63 = vpop.f32.mrf.mxu1  ;;  %v526_v0 = vpop.f32.mrf.mxu2 }
 0x1bd   :  { %v753_v1 = vpop.eup %752  ;;  %v413_v2 = vadd.f32 %v1100_v52, %v412_v63  ;;  %v527_v3 = vadd.f32 %v1138_v26, %v526_v0 }
 0x1be   :  { %642 = vst.msk [vmem:[%s1322_s7 + $0x28] sm:$0xff] %vm636_vm1, %v753_v1 }
 0x1bf   :  { %v462_v4 = vmax.f32 %v413_v2, 0.0  ;;  %754 = vtanh.f32 %v527_v3 }
 0x1c1   :  { %576 = vmatmul.f32.gmra.mxu2 %v462_v4 }
 0x1c4   :  { %v529_v5 = vpop.f32.mrf.mxu2 }
 0x1c5   :  { %v755_v6 = vpop.eup %754  ;;  %v530_v7 = vadd.f32 %v1138_v26, %v529_v5 }
 0x1c6   :  { %643 = vst.msk [vmem:[%s1322_s7 + $0x30] sm:$0xff] %vm636_vm1, %v755_v6 }
 0x1c7   :  { %756 = vtanh.f32 %v530_v7 }
 0x1ca   :  { %v415_v8 = vpop.f32.mrf.mxu3 }
 0x1cb   :  { %v416_v9 = vadd.f32 %v1100_v52, %v415_v8 }
 0x1cc   :  { %v532_v10 = vpop.f32.mrf.mxu2 }
 0x1cd   :  { %v757_v11 = vpop.eup %756  ;;  %v463_v12 = vmax.f32 %v416_v9, 0.0  ;;  %v533_v13 = vadd.f32 %v1138_v26, %v532_v10 }
 0x1ce   :  { %644 = vst.msk [vmem:[%s1322_s7 + $0x38] sm:$0xff] %vm636_vm1, %v757_v11 }
 0x1cf   :  { %758 = vtanh.f32 %v533_v13  ;;  %579 = vmatmul.f32.vlgmr.msra.gmra.mxu3 %v463_v12 }
 0x1d2   :  { %v418_v14 = vpop.f32.mrf.mxu3 }
 0x1d3   :  { %v419_v15 = vadd.f32 %v1100_v52, %v418_v14 }
 0x1d4   :  { %v535_v16 = vpop.f32.mrf.mxu2 }
 0x1d5   :  { %v759_v17 = vpop.eup %758  ;;  %v464_v18 = vmax.f32 %v419_v15, 0.0  ;;  %v536_v19 = vadd.f32 %v1138_v26, %v535_v16 }
 0x1d6   :  { %645 = vst.msk [vmem:[%s1322_s7 + $0x40] sm:$0xff] %vm636_vm1, %v759_v17 }
 0x1d7   :  { %760 = vtanh.f32 %v536_v19  ;;  %582 = vmatmul.f32.gmra.mxu3 %v464_v18 }
 0x1da   :  { %v421_v20 = vpop.f32.mrf.mxu3 }
 0x1db   :  { %v422_v21 = vadd.f32 %v1100_v52, %v421_v20 }
 0x1dc   :  { %v538_v22 = vpop.f32.mrf.mxu2 }
 0x1dd   :  { %v761_v23 = vpop.eup %760  ;;  %v465_v24 = vmax.f32 %v422_v21, 0.0  ;;  %v539_v25 = vadd.f32 %v1138_v26, %v538_v22 }
 0x1de   :  { %646 = vst.msk [vmem:[%s1322_s7 + $0x48] sm:$0xff] %vm636_vm1, %v761_v23 }
 0x1df   :  { %762 = vtanh.f32 %v539_v25  ;;  %585 = vmatmul.f32.gmra.mxu3 %v465_v24 }
 0x1e2   :  { %v424_v27 = vpop.f32.mrf.mxu3 }
 0x1e3   :  { %v425_v34 = vadd.f32 %v1100_v52, %v424_v27 }
 0x1e4   :  { %v541_v28 = vpop.f32.mrf.mxu2 }
 0x1e5   :  { %v763_v29 = vpop.eup %762  ;;  %v466_v30 = vmax.f32 %v425_v34, 0.0  ;;  %v542_v31 = vadd.f32 %v1138_v26, %v541_v28 }
 0x1e6   :  { %647 = vst.msk [vmem:[%s1322_s7 + $0x50] sm:$0xff] %vm636_vm1, %v763_v29 }
 0x1e7   :  { %764 = vtanh.f32 %v542_v31  ;;  %588 = vmatmul.f32.gmra.mxu3 %v466_v30 }
 0x1ea   :  { %v427_v32 = vpop.f32.mrf.mxu3 }
 0x1eb   :  { %v428_v33 = vadd.f32 %v1100_v52, %v427_v32 }
 0x1ec   :  { %v544_v35 = vpop.f32.mrf.mxu2 }
 0x1ed   :  { %v765_v36 = vpop.eup %764  ;;  %v467_v37 = vmax.f32 %v428_v33, 0.0  ;;  %v545_v38 = vadd.f32 %v1138_v26, %v544_v35 }
 0x1ee   :  { %648 = vst.msk [vmem:[%s1322_s7 + $0x58] sm:$0xff] %vm636_vm1, %v765_v36 }
 0x1ef   :  { %766 = vtanh.f32 %v545_v38  ;;  %591 = vmatmul.f32.gmra.mxu3 %v467_v37 }
 0x1f2   :  { %v430_v39 = vpop.f32.mrf.mxu3 }
 0x1f3   :  { %v431_v40 = vadd.f32 %v1100_v52, %v430_v39 }
 0x1f4   :  { %v547_v41 = vpop.f32.mrf.mxu2 }
 0x1f5   :  { %v767_v42 = vpop.eup %766  ;;  %v468_v43 = vmax.f32 %v431_v40, 0.0  ;;  %v548_v44 = vadd.f32 %v1138_v26, %v547_v41 }
 0x1f6   :  { %649 = vst.msk [vmem:[%s1322_s7 + $0x60] sm:$0xff] %vm636_vm1, %v767_v42 }
 0x1f7   :  { %768 = vtanh.f32 %v548_v44  ;;  %594 = vmatmul.f32.gmra.mxu3 %v468_v43 }
 0x1fa   :  { %v433_v45 = vpop.f32.mrf.mxu3 }
 0x1fb   :  { %v434_v46 = vadd.f32 %v1100_v52, %v433_v45 }
 0x1fc   :  { %v550_v47 = vpop.f32.mrf.mxu2 }
 0x1fd   :  { %v769_v48 = vpop.eup %768  ;;  %v469_v49 = vmax.f32 %v434_v46, 0.0  ;;  %v551_v50 = vadd.f32 %v1138_v26, %v550_v47 }
 0x1fe   :  { %650 = vst.msk [vmem:[%s1322_s7 + $0x68] sm:$0xff] %vm636_vm1, %v769_v48 }
 0x1ff   :  { %770 = vtanh.f32 %v551_v50  ;;  %597 = vmatmul.f32.gmra.mxu3 %v469_v49 }
 0x202   :  { %v436_v51 = vpop.f32.mrf.mxu3 }
 0x203   :  { %v437_v53 = vadd.f32 %v1100_v52, %v436_v51 }
 0x204   :  { %v553_v54 = vpop.f32.mrf.mxu2 }
 0x205   :  { %v771_v55 = vpop.eup %770  ;;  %v470_v56 = vmax.f32 %v437_v53, 0.0  ;;  %v554_v57 = vadd.f32 %v1138_v26, %v553_v54 }
 0x206   :  { %651 = vst.msk [vmem:[%s1322_s7 + $0x70] sm:$0xff] %vm636_vm1, %v771_v55 }
 0x207   :  { %772 = vtanh.f32 %v554_v57  ;;  %600 = vmatmul.f32.gmra.mxu3 %v470_v56 }
 0x20c   :  { %v556_v58 = vpop.f32.mrf.mxu2 }
 0x20d   :  { %v773_v59 = vpop.eup %772  ;;  %v557_v60 = vadd.f32 %v1138_v26, %v556_v58 }
 0x20e   :  { %652 = vst.msk [vmem:[%s1322_s7 + $0x78] sm:$0xff] %vm636_vm1, %v773_v59 }
 0x20f   :  { %774 = vtanh.f32 %v557_v60 }
 0x214   :  { %v559_v52 = vpop.f32.mrf.mxu2 }
 0x215   :  { %v775_v61 = vpop.eup %774  ;;  %v560_v62 = vadd.f32 %v1138_v26, %v559_v52 }
 0x216   :  { %653 = vst.msk [vmem:[%s1322_s7 + $0x80] sm:$0xff] %vm636_vm1, %v775_v61 }
 0x217   :  { %776 = vtanh.f32 %v560_v62 }
 0x21c   :  { %v562_v63 = vpop.f32.mrf.mxu2 }
 0x21d   :  { %v777_v0 = vpop.eup %776  ;;  %v563_v1 = vadd.f32 %v1138_v26, %v562_v63 }
 0x21e   :  { %654 = vst.msk [vmem:[%s1322_s7 + $0x88] sm:$0xff] %vm636_vm1, %v777_v0 }
 0x21f   :  { %778 = vtanh.f32 %v563_v1 }
 0x224   :  { %v565_v2 = vpop.f32.mrf.mxu2 }
 0x225   :  { %v779_v3 = vpop.eup %778  ;;  %v566_v4 = vadd.f32 %v1138_v26, %v565_v2 }
 0x226   :  { %655 = vst.msk [vmem:[%s1322_s7 + $0x90] sm:$0xff] %vm636_vm1, %v779_v3 }
 0x227   :  { %780 = vtanh.f32 %v566_v4 }
 0x22c   :  { %v568_v5 = vpop.f32.mrf.mxu2 }
 0x22d   :  { %v781_v6 = vpop.eup %780  ;;  %v569_v7 = vadd.f32 %v1138_v26, %v568_v5 }
 0x22e   :  { %656 = vst.msk [vmem:[%s1322_s7 + $0x98] sm:$0xff] %vm636_vm1, %v781_v6 }
 0x22f   :  { %782 = vtanh.f32 %v569_v7 }
 0x234   :  { %v571_v8 = vpop.f32.mrf.mxu2 }
 0x235   :  { %v783_v9 = vpop.eup %782  ;;  %v572_v10 = vadd.f32 %v1138_v26, %v571_v8 }
 0x236   :  { %657 = vst.msk [vmem:[%s1322_s7 + $0xa0] sm:$0xff] %vm636_vm1, %v783_v9 }
 0x237   :  { %784 = vtanh.f32 %v572_v10 }
 0x23c   :  { %v574_v11 = vpop.f32.mrf.mxu2 }
 0x23d   :  { %v785_v12 = vpop.eup %784  ;;  %v575_v13 = vadd.f32 %v1138_v26, %v574_v11 }
 0x23e   :  { %658 = vst.msk [vmem:[%s1322_s7 + $0xa8] sm:$0xff] %vm636_vm1, %v785_v12 }
 0x23f   :  { %786 = vtanh.f32 %v575_v13 }
 0x244   :  { %v577_v14 = vpop.f32.mrf.mxu2 }
 0x245   :  { %v787_v15 = vpop.eup %786  ;;  %v578_v16 = vadd.f32 %v1138_v26, %v577_v14 }
 0x246   :  { %659 = vst.msk [vmem:[%s1322_s7 + $0xb0] sm:$0xff] %vm636_vm1, %v787_v15 }
 0x247   :  { %788 = vtanh.f32 %v578_v16 }
 0x24d   :  { %v789_v17 = vpop.eup %788 }
 0x24e   :  { %660 = vst.msk [vmem:[%s1322_s7 + $0xb8] sm:$0xff] %vm636_vm1, %v789_v17 }
 0x252   :  { %v580_v18 = vpop.f32.mrf.mxu3 }
 0x253   :  { %v581_v19 = vadd.f32 %v1138_v26, %v580_v18 }
 0x255   :  { %790 = vtanh.f32 %v581_v19 }
 0x25a   :  { %v583_v20 = vpop.f32.mrf.mxu3 }
 0x25b   :  { %v791_v21 = vpop.eup %790  ;;  %v584_v22 = vadd.f32 %v1138_v26, %v583_v20 }
 0x25c   :  { %661 = vst.msk [vmem:[%s1322_s7 + $0xc0] sm:$0xff] %vm636_vm1, %v791_v21 }
 0x25d   :  { %792 = vtanh.f32 %v584_v22 }
 0x262   :  { %v586_v23 = vpop.f32.mrf.mxu3 }
 0x263   :  { %v793_v24 = vpop.eup %792  ;;  %v587_v25 = vadd.f32 %v1138_v26, %v586_v23 }
 0x264   :  { %662 = vst.msk [vmem:[%s1322_s7 + $0xc8] sm:$0xff] %vm636_vm1, %v793_v24 }
 0x265   :  { %794 = vtanh.f32 %v587_v25 }
 0x26a   :  { %v589_v27 = vpop.f32.mrf.mxu3 }
 0x26b   :  { %v795_v34 = vpop.eup %794  ;;  %v590_v28 = vadd.f32 %v1138_v26, %v589_v27 }
 0x26c   :  { %663 = vst.msk [vmem:[%s1322_s7 + $0xd0] sm:$0xff] %vm636_vm1, %v795_v34 }
 0x26d   :  { %796 = vtanh.f32 %v590_v28 }
 0x272   :  { %v592_v29 = vpop.f32.mrf.mxu3 }
 0x273   :  { %v797_v30 = vpop.eup %796  ;;  %v593_v31 = vadd.f32 %v1138_v26, %v592_v29 }
 0x274   :  { %664 = vst.msk [vmem:[%s1322_s7 + $0xd8] sm:$0xff] %vm636_vm1, %v797_v30 }
 0x275   :  { %798 = vtanh.f32 %v593_v31 }
 0x27a   :  { %v595_v32 = vpop.f32.mrf.mxu3 }
 0x27b   :  { %v799_v33 = vpop.eup %798  ;;  %v596_v35 = vadd.f32 %v1138_v26, %v595_v32 }
 0x27c   :  { %665 = vst.msk [vmem:[%s1322_s7 + $0xe0] sm:$0xff] %vm636_vm1, %v799_v33 }
 0x27d   :  { %800 = vtanh.f32 %v596_v35 }
 0x282   :  { %v598_v36 = vpop.f32.mrf.mxu3 }
 0x283   :  { %v801_v37 = vpop.eup %800  ;;  %v599_v38 = vadd.f32 %v1138_v26, %v598_v36 }
 0x284   :  { %666 = vst.msk [vmem:[%s1322_s7 + $0xe8] sm:$0xff] %vm636_vm1, %v801_v37 }
 0x285   :  { %802 = vtanh.f32 %v599_v38 }
 0x28a   :  { %v601_v39 = vpop.f32.mrf.mxu3 }
 0x28b   :  { %v803_v40 = vpop.eup %802  ;;  %v602_v41 = vadd.f32 %v1138_v26, %v601_v39 }
 0x28c   :  { %667 = vst.msk [vmem:[%s1322_s7 + $0xf0] sm:$0xff] %vm636_vm1, %v803_v40 }
 0x28d   :  { %804 = vtanh.f32 %v602_v41 }
 0x293   :  { %v805_v42 = vpop.eup %804 }
 0x294   :  { %668 = vst.msk [vmem:[%s1322_s7 + $0xf8] sm:$0xff] %vm636_vm1, %v805_v42 }

</bundles_post_ra>
